<compile_context>
chip_gen: v5e
topology: v5e:2x2
jax: 0.10.0
libtpu: 0.0.40
codegen_flags: <defaults>
</compile_context>

<pallas_src>
import jax
import jax.numpy as jnp
from jax.experimental import pallas as pl
from jax.experimental.pallas import tpu as pltpu

# ---- module hyper-parameters (synthetic, small) -----------------------------
DIM = 32          # input channel dim (C)
OUT_DIM = 16      # out_dim
UP_FACTOR = 2     # up_factor (r)
EPS = 1e-5        # nn.LayerNorm default eps

LANES = 128
PACK = LANES // DIM          # 4 original rows folded into the 128-lane dim
PACKED_ROW_TILE = 2048       # packed rows per grid step (= 8192 original rows)
                             # -> 1 MiB f32 x-block + 1 MiB out-block; ~4.3 MiB
                             # double-buffered VMEM per step on all generations.


def _round_up(a, b):
    return ((a + b - 1) // b) * b


def _patch_split_kernel(x_ref, avg_ref, w_ref, b_ref, o_ref):
    """Fused LayerNorm + bias-free Linear on a lane-packed row block.

    x_ref:   (T, 128)   4 original token rows per packed row (32 lanes each)
    avg_ref: (128, 128) block-diag ones/C -> per-32-lane-group mean, broadcast
    w_ref:   (128, 128) block-diag of (gamma[:, None] * w_perm)
    b_ref:   (1, 128)   (beta @ w_perm) tiled over the 4 lane groups
    o_ref:   (T, 128)
    """
    x = x_ref[...].astype(jnp.float32)
    avg = avg_ref[...]

    # Per-group LayerNorm stats via block-diagonal averaging matmuls.  The MXU
    # has huge slack in this HBM-bound kernel, and this avoids any
    # lane<->sublane relayout of the (T, 128) block.
    mean = jnp.dot(x, avg, preferred_element_type=jnp.float32)        # (T, 128)
    xc = x - mean
    var = jnp.dot(xc * xc, avg, preferred_element_type=jnp.float32)   # (T, 128)
    xn = xc * jax.lax.rsqrt(var + EPS)

    # gamma folded into w, beta folded into the (1, 128) bias.
    y = jnp.dot(xn, w_ref[...], preferred_element_type=jnp.float32) + b_ref[...]
    o_ref[...] = y.astype(o_ref.dtype)


def patch_split(x, gamma, beta, weight):
    """x: (B, N, C) -> (B, N*UP_FACTOR, OUT_DIM), matching the PyTorch module.

    NOTE: `weight` is expected as (C, OUT_DIM*UP_FACTOR), i.e. the transpose of
    PyTorch nn.Linear.weight (which is (out_features, in_features)).
    """
    B, N, C = x.shape
    R = UP_FACTOR
    D_out = OUT_DIM * R
    assert C == DIM and LANES % C == 0
    assert weight.shape == (C, D_out), "pass nn.Linear.weight transposed: (in, out)"
    Wout = PACK * D_out
    assert Wout == LANES, "lane-dense packing needs OUT_DIM*UP_FACTOR == DIM"

    f32 = jnp.float32

    # One-time column permutation '(c r)' -> '(r c)': after this, the matmul
    # output columns are already in rearranged order and the final rearrange is
    # a free metadata reshape.
    w_perm = weight.astype(f32).reshape(C, OUT_DIM, R)
    w_perm = jnp.transpose(w_perm, (0, 2, 1)).reshape(C, D_out)

    # Fold the LN affine into the matmul:
    #   (xn * gamma + beta) @ W == xn @ (gamma[:, None] * W) + beta @ W
    w_fold = gamma.astype(f32)[:, None] * w_perm                       # (C, D_out)
    bias = beta.astype(f32) @ w_perm                                   # (D_out,)

    # Lane-dense (128-wide) block-diagonal constants (built once in the wrapper).
    eye = jnp.eye(PACK, dtype=f32)
    w_big = jnp.kron(eye, w_fold)                                      # (128, 128)
    avg_big = jnp.kron(eye, jnp.full((C, C), 1.0 / C, dtype=f32))      # (128, 128)
    bias_big = jnp.tile(bias, PACK).reshape(1, Wout)                   # (1, 128)

    # ---- row packing / tiling (always cdiv grid + pad; no VMEM-resident path)
    M = B * N
    Mp = pl.cdiv(M, PACK)                         # packed rows needed
    tile = min(PACKED_ROW_TILE, _round_up(Mp, 8))
    n_tiles = pl.cdiv(Mp, tile)
    if n_tiles > 1 and n_tiles % 2:
        n_tiles += 1          # even grid length -> balanced across v7x's 2 TCs
    Mp_pad = n_tiles * tile
    M_pad = Mp_pad * PACK

    x2d = x.reshape(M, C)                         # pure-metadata reshape
    if M_pad != M:
        x2d = jnp.pad(x2d, ((0, M_pad - M), (0, 0)))
    x_packed = x2d.reshape(Mp_pad, PACK * C)      # (Mp_pad, 128), metadata reshape

    y = pl.pallas_call(
        _patch_split_kernel,
        out_shape=jax.ShapeDtypeStruct((Mp_pad, Wout), x.dtype),
        grid=(n_tiles,),
        in_specs=[
            pl.BlockSpec((tile, PACK * C), lambda i: (i, 0)),    # x (packed rows)
            pl.BlockSpec((LANES, LANES), lambda i: (0, 0)),      # averaging matrix
            pl.BlockSpec((LANES, Wout), lambda i: (0, 0)),       # block-diag weight
            pl.BlockSpec((1, Wout), lambda i: (0, 0)),           # bias row
        ],
        out_specs=pl.BlockSpec((tile, Wout), lambda i: (i, 0)),
        compiler_params=pltpu.CompilerParams(
            dimension_semantics=("parallel",),
            vmem_limit_bytes=16 * 1024 * 1024,    # ~4.3 MiB used; safe on v5e/v6e/v7x
        ),
    )(x_packed, avg_big, w_big, bias_big)

    # (Mp_pad, 128) -> (M_pad, D_out) is a free metadata reshape; drop padding.
    y = y.reshape(M_pad, D_out)
    if M_pad != M:
        y = y[:M]
    return y.reshape(B, N * R, OUT_DIM)


def patch_split_reference(x, gamma, beta, weight):
    """Pure-JAX reference of the PyTorch module (non-permuted weight path)."""
    x = x.astype(jnp.float32)
    mean = jnp.mean(x, axis=-1, keepdims=True)
    var = jnp.mean((x - mean) ** 2, axis=-1, keepdims=True)
    xn = (x - mean) / jnp.sqrt(var + EPS) * gamma + beta
    y = xn @ weight.astype(jnp.float32)
    B, N, _ = x.shape
    y = y.reshape(B, N, OUT_DIM, UP_FACTOR)
    y = jnp.transpose(y, (0, 1, 3, 2))
    return y.reshape(B, N * UP_FACTOR, OUT_DIM)


if __name__ == "__main__":
    key = jax.random.PRNGKey(0)
    kx, kw, kg, kb = jax.random.split(key, 4)

    B, N = 2, 8
    x = jax.random.normal(kx, (B, N, DIM), dtype=jnp.float32)

    # Deterministic synthetic parameters (shapes from __init__):
    #   norm: gamma/beta (DIM,)   reduction: weight (DIM, OUT_DIM*UP_FACTOR)
    gamma = 1.0 + 0.1 * jax.random.normal(kg, (DIM,), dtype=jnp.float32)
    beta = 0.1 * jax.random.normal(kb, (DIM,), dtype=jnp.float32)
    weight = jax.random.normal(kw, (DIM, OUT_DIM * UP_FACTOR),
                               dtype=jnp.float32) / jnp.sqrt(DIM)

    out = jax.block_until_ready(patch_split(x, gamma, beta, weight))

    ref = patch_split_reference(x, gamma, beta, weight)
    assert out.shape == (B, N * UP_FACTOR, OUT_DIM), out.shape
    assert jnp.allclose(out, ref, atol=1e-4, rtol=1e-4), "mismatch vs reference"

    print("KERNEL_OK")
</pallas_src>

<mosaic_0001>
module attributes {stable_mosaic.version = 11 : i64} {
  func.func @_patch_split_kernel(%arg0: i32, %arg1: memref<8x128xf32, #tpu.memory_space<vmem>>, %arg2: memref<128x128xf32, #tpu.memory_space<vmem>>, %arg3: memref<128x128xf32, #tpu.memory_space<vmem>>, %arg4: memref<1x128xf32, #tpu.memory_space<vmem>>, %arg5: memref<8x128xf32, #tpu.memory_space<vmem>>) attributes {dimension_semantics = [#tpu.dimension_semantics<parallel>], iteration_bounds = array<i64: 1>, scalar_prefetch = 0 : i64, scratch_operands = 0 : i64, tpu.core_type = #tpu.core_type<tc>, window_params = [{transform_indices = @transform_0, window_bounds = array<i64: 8, 128>}, {pipeline_mode = #tpu.pipeline_mode<synchronous>, transform_indices = @transform_1, window_bounds = array<i64: 128, 128>}, {pipeline_mode = #tpu.pipeline_mode<synchronous>, transform_indices = @transform_2, window_bounds = array<i64: 128, 128>}, {pipeline_mode = #tpu.pipeline_mode<synchronous>, transform_indices = @transform_3, window_bounds = array<i64: 1, 128>}, {transform_indices = @transform_4, window_bounds = array<i64: 8, 128>}]} {
    %c0 = arith.constant 0 : index
    %c0_0 = arith.constant 0 : index
    %0 = vector.load %arg1[%c0, %c0_0] : memref<8x128xf32, #tpu.memory_space<vmem>>, vector<8x128xf32>
    %c0_1 = arith.constant 0 : index
    %c0_2 = arith.constant 0 : index
    %1 = vector.load %arg2[%c0_1, %c0_2] : memref<128x128xf32, #tpu.memory_space<vmem>>, vector<128x128xf32>
    %cst = arith.constant dense<0.000000e+00> : vector<8x128xf32>
    %2 = tpu.matmul %0, %1, %cst {dimension_numbers = #tpu.dot_dimension_numbers<[1], [0], [0], [1], [0, 0, 1, 1], [], []>} : vector<8x128xf32>, vector<128x128xf32>, vector<8x128xf32> -> vector<8x128xf32>
    %3 = arith.subf %0, %2 : vector<8x128xf32>
    %4 = arith.mulf %3, %3 : vector<8x128xf32>
    %cst_3 = arith.constant dense<0.000000e+00> : vector<8x128xf32>
    %5 = tpu.matmul %4, %1, %cst_3 {dimension_numbers = #tpu.dot_dimension_numbers<[1], [0], [0], [1], [0, 0, 1, 1], [], []>} : vector<8x128xf32>, vector<128x128xf32>, vector<8x128xf32> -> vector<8x128xf32>
    %cst_4 = arith.constant 9.99999974E-6 : f32
    %6 = vector.broadcast %cst_4 : f32 to vector<8x128xf32>
    %7 = arith.addf %5, %6 : vector<8x128xf32>
    %8 = math.rsqrt %7 : vector<8x128xf32>
    %9 = arith.mulf %3, %8 : vector<8x128xf32>
    %c0_5 = arith.constant 0 : index
    %c0_6 = arith.constant 0 : index
    %10 = vector.load %arg3[%c0_5, %c0_6] : memref<128x128xf32, #tpu.memory_space<vmem>>, vector<128x128xf32>
    %cst_7 = arith.constant dense<0.000000e+00> : vector<8x128xf32>
    %11 = tpu.matmul %9, %10, %cst_7 {dimension_numbers = #tpu.dot_dimension_numbers<[1], [0], [0], [1], [0, 0, 1, 1], [], []>} : vector<8x128xf32>, vector<128x128xf32>, vector<8x128xf32> -> vector<8x128xf32>
    %c0_8 = arith.constant 0 : index
    %c0_9 = arith.constant 0 : index
    %12 = vector.load %arg4[%c0_8, %c0_9] : memref<1x128xf32, #tpu.memory_space<vmem>>, vector<1x128xf32>
    %13 = vector.broadcast %12 : vector<1x128xf32> to vector<8x128xf32>
    %14 = arith.addf %11, %13 : vector<8x128xf32>
    %c0_10 = arith.constant 0 : index
    %c0_11 = arith.constant 0 : index
    %15 = vector.load %arg5[%c0_10, %c0_11] : memref<8x128xf32, #tpu.memory_space<vmem>>, vector<8x128xf32>
    tpu.vector_store %arg5[%c0_10, %c0_11], %14 {strides = array<i32>} : memref<8x128xf32, #tpu.memory_space<vmem>>, vector<8x128xf32>,
    return
  }
  func.func @transform_0(%arg0: i32) -> (i32, i32) {
    %c0_i32 = arith.constant 0 : i32
    %c0_i32_0 = arith.constant 0 : i32
    return %arg0, %c0_i32 : i32, i32
  }
  func.func @transform_1(%arg0: i32) -> (i32, i32) {
    %c0_i32 = arith.constant 0 : i32
    %c0_i32_0 = arith.constant 0 : i32
    %c0_i32_1 = arith.constant 0 : i32
    return %c0_i32, %c0_i32_0 : i32, i32
  }
  func.func @transform_2(%arg0: i32) -> (i32, i32) {
    %c0_i32 = arith.constant 0 : i32
    %c0_i32_0 = arith.constant 0 : i32
    %c0_i32_1 = arith.constant 0 : i32
    return %c0_i32, %c0_i32_0 : i32, i32
  }
  func.func @transform_3(%arg0: i32) -> (i32, i32) {
    %c0_i32 = arith.constant 0 : i32
    %c0_i32_0 = arith.constant 0 : i32
    %c0_i32_1 = arith.constant 0 : i32
    return %c0_i32, %c0_i32_0 : i32, i32
  }
  func.func @transform_4(%arg0: i32) -> (i32, i32) {
    %c0_i32 = arith.constant 0 : i32
    %c0_i32_0 = arith.constant 0 : i32
    return %arg0, %c0_i32 : i32, i32
  }
}

</mosaic_0001>

<bundles_post_ra>
// kernel: tpu_custom_call.1
= control target key start
LH: loop header
LB: loop body
LE: loop exit
PB: predicated region body
PF: predicated region fallthrough
CT: control target
= control target key end

     0   :  { %9 = vsyncpa [#allocation3], 0  ;;  %s349_s0 = inlined_call_operand.hbm [shape: f32[8,128], index: 0, kind: input, shape index: {}]   ;;  %s350_s1 = inlined_call_operand.hbm [shape: f32[128,128], index: 1, kind: input, shape index: {}]   ;;  %s351_s2 = inlined_call_operand.hbm [shape: f32[128,128], index: 2, kind: input, shape index: {}]   ;;  %s352_s3 = inlined_call_operand.vmem [shape: f32[1,128], index: 3, kind: input, shape index: {}]   ;;  %s353_s4 = inlined_call_operand.hbm [shape: f32[8,128], index: 4, kind: output, shape index: {}]  }
   0x1   :  { %10 = vsyncpa [#allocation6], 0  ;;  %s27_s17 = sshll.u32 %s350_s1, 4  ;;  %s28_s17 = int_to_ptr.hbm [resolvable:$true] %s27_s17 }
   0x2   :  { %11 = vsyncpa [#allocation4], 0  ;;  %s303_s18 = smov [#allocation5]   ;;  %s17_s22 = sshll.u32 %s349_s0, 4  ;;  %s18_s22 = int_to_ptr.hbm [resolvable:$true] %s17_s22 }
   0x3   :  { %s29_s19 = sshll.u32 %s303_s18, 4  ;;  %s304_s23 = smov 128   ;;  %s30_s19 = int_to_ptr.vmem [resolvable:$true] %s29_s19 }
   0x4   :  { %s305_s24 = smov 8   ;;  %s306_s25 = smov [#allocation2]  }
   0x5   :  { %35 = dma.hbm_to_vmem [thread:$0]  %s28_s17, 2048, %s30_s19, [#allocation6], %s304_s23, %s304_s23, %s305_s24  }
   0x6   :  { %s19_s26 = sshll.u32 %s306_s25, 4  ;;  %s40_s29 = sshll.u32 %s351_s2, 4  ;;  %s20_s26 = int_to_ptr.vmem [resolvable:$true] %s19_s26  ;;  %s41_s29 = int_to_ptr.hbm [resolvable:$true] %s40_s29 }
   0x7   :  { %22 = dma.hbm_to_vmem [thread:$0]  %s18_s22, 128, %s20_s26, [#allocation3]  }
   0x8   :  { %s307_s1 = smov [#allocation7]  }
   0x9   :  { %s42_s30 = sshll.u32 %s307_s1, 4  ;;  %s43_s30 = int_to_ptr.vmem [resolvable:$true] %s42_s30 }
   0xa   :  { %48 = dma.hbm_to_vmem [thread:$0]  %s41_s29, 2048, %s43_s30, [#allocation6], %s304_s23, %s304_s23, %s305_s24  }
   0xb   :  { %297 = dma.done.wait [#allocation3], 128  }
   0xc   :  { %298 = vsyncadd [#allocation3], 4294967168 }
   0xd   :  { %299 = dma.done.wait [#allocation6], 4096  }
   0xe   :  { %300 = vsyncadd [#allocation6], 4294963200  ;;  %v79_v0 = vld [vmem:[#allocation5 + $0x78] sm:$0xff]  ;;  %v78_v1 = vld [vmem:[#allocation5 + $0x70] sm:$0xff]  ;;  %s308_s5 = smov [#allocation8]   ;;  %s181_s9 = sshll.u32 %s353_s4, 4  ;;  %s182_s9 = int_to_ptr.hbm [resolvable:$true] %s181_s9 }
   0xf   :  { %80 = vmatpush.msra.mxu0 %v79_v0  ;;  %102 = vmatpush.msra.mxu1 %v79_v0  ;;  %v77_v2 = vld [vmem:[#allocation5 + $0x68] sm:$0xff]  ;;  %v76_v3 = vld [vmem:[#allocation5 + $0x60] sm:$0xff]  ;;  %v75_v4 = vld [vmem:[#allocation5 + $0x58] sm:$0xff]  ;;  %s179_s6 = sshll.u32 %s308_s5, 4  ;;  %s180_s6 = int_to_ptr.vmem [resolvable:$true] %s179_s6 }
  0x10   :  { %v74_v5 = vld [vmem:[#allocation5 + $0x50] sm:$0xff]  ;;  %v73_v6 = vld [vmem:[#allocation5 + $0x48] sm:$0xff]  ;;  %v72_v7 = vld [vmem:[#allocation5 + $0x40] sm:$0xff] }
  0x11   :  { %81 = vmatpush.msra.mxu0 %v78_v1  ;;  %103 = vmatpush.msra.mxu1 %v78_v1  ;;  %v71_v8 = vld [vmem:[#allocation5 + $0x38] sm:$0xff]  ;;  %v70_v9 = vld [vmem:[#allocation5 + $0x30] sm:$0xff]  ;;  %v69_v10 = vld [vmem:[#allocation5 + $0x28] sm:$0xff] }
  0x12   :  { %v68_v11 = vld [vmem:[#allocation5 + $0x20] sm:$0xff]  ;;  %v67_v12 = vld [vmem:[#allocation5 + $0x18] sm:$0xff]  ;;  %v66_v13 = vld [vmem:[#allocation5 + $0x10] sm:$0xff] }
  0x13   :  { %82 = vmatpush.msra.mxu0 %v77_v2  ;;  %104 = vmatpush.msra.mxu1 %v77_v2  ;;  %v65_v14 = vld [vmem:[#allocation5 + $0x8] sm:$0xff]  ;;  %v64_v15 = vld [vmem:[#allocation5] sm:$0xff]  ;;  %v63_v16 = vld [vmem:[#allocation2] sm:$0xff] }
  0x14   :  { %v148_v17 = vld [vmem:[#allocation7 + $0x78] sm:$0xff]  ;;  %v147_v18 = vld [vmem:[#allocation7 + $0x70] sm:$0xff]  ;;  %v146_v19 = vld [vmem:[#allocation7 + $0x68] sm:$0xff] }
  0x15   :  { %83 = vmatpush.msra.mxu0 %v76_v3  ;;  %105 = vmatpush.msra.mxu1 %v76_v3  ;;  %v145_v20 = vld [vmem:[#allocation7 + $0x60] sm:$0xff]  ;;  %v144_v24 = vld [vmem:[#allocation7 + $0x58] sm:$0xff]  ;;  %v143_v25 = vld [vmem:[#allocation7 + $0x50] sm:$0xff] }
  0x16   :  { %153 = vmatpush.msra.mxu2 %v148_v17  ;;  %v142_v26 = vld [vmem:[#allocation7 + $0x48] sm:$0xff]  ;;  %v141_v27 = vld [vmem:[#allocation7 + $0x40] sm:$0xff]  ;;  %v140_v28 = vld [vmem:[#allocation7 + $0x38] sm:$0xff] }
  0x17   :  { %84 = vmatpush.msra.mxu0 %v75_v4  ;;  %106 = vmatpush.msra.mxu1 %v75_v4  ;;  %v139_v29 = vld [vmem:[#allocation7 + $0x30] sm:$0xff]  ;;  %v138_v30 = vld [vmem:[#allocation7 + $0x28] sm:$0xff]  ;;  %v137_v31 = vld [vmem:[#allocation7 + $0x20] sm:$0xff] }
  0x18   :  { %154 = vmatpush.msra.mxu2 %v147_v18  ;;  %v136_v32 = vld [vmem:[#allocation7 + $0x18] sm:$0xff]  ;;  %v135_v33 = vld [vmem:[#allocation7 + $0x10] sm:$0xff]  ;;  %v134_v34 = vld [vmem:[#allocation7 + $0x8] sm:$0xff] }
  0x19   :  { %85 = vmatpush.msra.mxu0 %v74_v5  ;;  %107 = vmatpush.msra.mxu1 %v74_v5  ;;  %v133_v35 = vld [vmem:[#allocation7] sm:$0xff]  ;;  %v198_v46 = vld [vmem:[%s352_s3] ss:$0 sm:$0xff] }
  0x1a   :  { %155 = vmatpush.msra.mxu2 %v146_v19 }
  0x1b   :  { %86 = vmatpush.msra.mxu0 %v73_v6  ;;  %108 = vmatpush.msra.mxu1 %v73_v6 }
  0x1c   :  { %156 = vmatpush.msra.mxu2 %v145_v20 }
  0x1d   :  { %87 = vmatpush.msra.mxu0 %v72_v7  ;;  %109 = vmatpush.msra.mxu1 %v72_v7 }
  0x1e   :  { %157 = vmatpush.msra.mxu2 %v144_v24 }
  0x1f   :  { %88 = vmatpush.msra.mxu0 %v71_v8  ;;  %110 = vmatpush.msra.mxu1 %v71_v8 }
  0x20   :  { %158 = vmatpush.msra.mxu2 %v143_v25 }
  0x21   :  { %89 = vmatpush.msra.mxu0 %v70_v9  ;;  %111 = vmatpush.msra.mxu1 %v70_v9 }
  0x22   :  { %159 = vmatpush.msra.mxu2 %v142_v26 }
  0x23   :  { %90 = vmatpush.msra.mxu0 %v69_v10  ;;  %112 = vmatpush.msra.mxu1 %v69_v10 }
  0x24   :  { %160 = vmatpush.msra.mxu2 %v141_v27 }
  0x25   :  { %91 = vmatpush.msra.mxu0 %v68_v11  ;;  %113 = vmatpush.msra.mxu1 %v68_v11 }
  0x26   :  { %161 = vmatpush.msra.mxu2 %v140_v28 }
  0x27   :  { %92 = vmatpush.msra.mxu0 %v67_v12  ;;  %114 = vmatpush.msra.mxu1 %v67_v12 }
  0x28   :  { %162 = vmatpush.msra.mxu2 %v139_v29 }
  0x29   :  { %93 = vmatpush.msra.mxu0 %v66_v13  ;;  %115 = vmatpush.msra.mxu1 %v66_v13 }
  0x2a   :  { %163 = vmatpush.msra.mxu2 %v138_v30 }
  0x2b   :  { %94 = vmatpush.msra.mxu0 %v65_v14  ;;  %116 = vmatpush.msra.mxu1 %v65_v14 }
  0x2c   :  { %164 = vmatpush.msra.mxu2 %v137_v31 }
  0x2d   :  { %95 = vmatpush.msra.mxu0 %v64_v15  ;;  %117 = vmatpush.msra.mxu1 %v64_v15 }
  0x2e   :  { %96 = vmatmul.f32.vlgmr.msra.gmra.mxu0 %v63_v16  ;;  %165 = vmatpush.msra.mxu2 %v136_v32 }
  0x30   :  { %166 = vmatpush.msra.mxu2 %v135_v33 }
  0x32   :  { %167 = vmatpush.msra.mxu2 %v134_v34 }
  0x34   :  { %168 = vmatpush.msra.mxu2 %v133_v35 }
  0xab   :  { %v97_v21 = vpop.f32.mrf.mxu0 }
  0xac   :  { %v100_v22 = vsub.f32 %v63_v16, %v97_v21 }
  0xae   :  { %v101_v23 = vmul.f32 %v100_v22, %v100_v22 }
  0xb0   :  { %118 = vmatmul.f32.vlgmr.msra.gmra.mxu1 %v101_v23 }
 0x12d   :  { %v119_v36 = vpop.f32.mrf.mxu1 }
 0x12e   :  { %v120_v37 = vadd.f32 1e-05, %v119_v36 }
 0x130   :  { %199 = vrsqrt.f32 %v120_v37  ;;  %vm128_vm1 = vweird.f32 %v120_v37 }
 0x136   :  { %v200_v38 = vpop.eup %199 }
 0x137   :  { %v123_v39 = vmul.f32 %v200_v38, %v120_v37  ;;  %vm129_vm0 = vweird.f32 %v200_v38 }
 0x138   :  { %vm130_vm2 = vmor %vm128_vm1, %vm129_vm0 }
 0x139   :  { %v124_v40 = vmul.f32 %v200_v38, %v123_v39 }
 0x13b   :  { %v125_v41 = vmul.f32 0.5, %v124_v40 }
 0x13d   :  { %v126_v42 = vsub.f32 1.5, %v125_v41 }
 0x13f   :  { %v127_v43 = vmul.f32 %v200_v38, %v126_v42 }
 0x141   :  { %v131_v44 = vsel %vm130_vm2, %v200_v38, %v127_v43 }
 0x142   :  { %v132_v45 = vmul.f32 %v131_v44, %v100_v22 }
 0x144   :  { %169 = vmatmul.f32.vlgmr.msra.gmra.mxu2 %v132_v45 }
 0x1c7   :  { %v170_v47 = vpop.f32.mrf.mxu2 }
 0x1c8   :  { %v171_v48 = vadd.f32 %v198_v46, %v170_v47 }
 0x1ca   :  { %173 = vst [vmem:[#allocation8] sm:$0xff] %v171_v48 }
 0x1cb   :  { %184 = dma.vmem_to_hbm [thread:$0]  %s180_s6, 128, %s182_s9, [#allocation4]  }
 0x1cc   :  { %301 = dma.done.wait [#allocation4], 128  }
 0x1cd   :  { %302 = vsyncadd [#allocation4], 4294967168 }
 0x1ce   :  { %189 = vsyncpa [#allocation3], 1 }
 0x1cf   :  { %190 = vsyncpa [#allocation6], 1 }
 0x1d0   :  { %191 = vsyncpa [#allocation4], 1 }

</bundles_post_ra>
